<compile_context>
chip_gen: v5e
topology: v5e:2x2
jax: 0.10.0
libtpu: 0.0.40
codegen_flags: <defaults>
</compile_context>

<pallas_src>
import functools

import jax
import jax.numpy as jnp
from jax.experimental import pallas as pl
from jax.experimental.pallas import tpu as pltpu

_LANE = 128
_SUBLANE = 8


def _round_up(x, m):
    return ((x + m - 1) // m) * m


def _pad2(a, rows, cols):
    """Zero-pad a 2-D array up to (rows, cols)."""
    return jnp.pad(a, ((0, rows - a.shape[0]), (0, cols - a.shape[1])))


def _silu(x):
    return x * jax.nn.sigmoid(x)


def _vmem_cap_bytes():
    """Generation-aware VMEM cap: ~3/4 of the reported per-core VMEM.
    Fallback 48 MiB is safe under v7x's 64 MiB/TC; v6e/v5e (128 MiB) report a
    larger capacity and therefore get a higher cap so bigger nets can keep all
    weights resident."""
    try:
        cap = int(getattr(pltpu.get_tpu_info(), "vmem_capacity_bytes", 0))
        if cap > 0:
            return (cap * 3) // 4
    except Exception:
        pass
    return 48 << 20


def _resident_spec(shape):
    """BlockSpec for a weight/bias that never changes block index.
    Buffered(1) => a single resident VMEM buffer (no double buffering)."""
    idx_map = lambda i: (0, 0)
    try:
        return pl.BlockSpec(shape, idx_map, pipeline_mode=pl.Buffered(1))
    except Exception:
        # Older jax without pipeline_mode/Buffered: fall back to default.
        return pl.BlockSpec(shape, idx_map)


def _make_kernel(n_mid):
    """Fused MLP kernel body.

    Ref order: x, w0, b0, (w_i, b_i) * n_mid, w_out, b_out, nd_out.
    All matmuls hit the MXU with f32 accumulation; bias adds + SiLU stay in
    f32 on the VPU/EUP; activations are cast to the weight dtype at dot inputs
    (a no-op when compute_dtype == f32, e.g. on v5e).
    """

    def kernel(x_ref, w0_ref, b0_ref, *rest):
        mid_refs = rest[:2 * n_mid]
        w_out_ref, b_out_ref, nd_ref = rest[2 * n_mid:]
        cdt = w0_ref.dtype

        # First layer: single dot on the combined [obs | ac] stream.
        h = jnp.dot(x_ref[...], w0_ref[...],
                    preferred_element_type=jnp.float32)
        h = _silu(h + b0_ref[...])

        # Middle hidden layers (numLayers - 1 of them).
        for li in range(n_mid):
            w_ref = mid_refs[2 * li]
            b_ref = mid_refs[2 * li + 1]
            h = _silu(jnp.dot(h.astype(cdt), w_ref[...],
                              preferred_element_type=jnp.float32)
                      + b_ref[...])

        # Output layer (no activation) -> normalized deltas.
        nd = jnp.dot(h.astype(cdt), w_out_ref[...],
                     preferred_element_type=jnp.float32) + b_out_ref[...]
        nd_ref[...] = nd.astype(nd_ref.dtype)

    return kernel


def prepare_params(params, stats, *, compute_dtype=jnp.bfloat16):
    """One-time weight preparation (cache the result and reuse it!).

    * Folds observation normalization into the first-layer weights/bias:
        (x - mean)/std @ W  ==  x @ (W/std) + (-mean/std) @ W
      The fold is done entirely in f32; the bf16 cast (if any) happens last.
    * Concatenates the obs/ac halves of the first-layer weight into one
      combined lane-dense weight so the kernel does a single first-layer dot.
    * Zero-pads every weight/bias to multiples of 128 lanes so all matmul
      operands and the output store are lane-dense (zero padding keeps the
      math exact).  Biases stay f32; matmul operands use compute_dtype.
    """
    f32 = jnp.float32
    w0_obs = params["w0_obs"].astype(f32)                   # (ob_dim, H)
    w0_ac = params["w0_ac"].astype(f32)                     # (n_acts, H)
    ob_dim, hidden = w0_obs.shape
    n_acts = w0_ac.shape[0]

    in_p = _round_up(ob_dim + n_acts, _LANE)
    hid_p = _round_up(hidden, _LANE)
    out_p = _round_up(ob_dim, _LANE)

    # Fold obs normalization into the obs half of the first layer (f32).
    inv_std = 1.0 / stats["obs_std"].astype(f32)             # (1, ob_dim)
    w0_obs_eff = w0_obs * inv_std.T                          # (ob_dim, H)
    b0_eff = (params["b0"].astype(f32)
              - (stats["obs_mean"].astype(f32) * inv_std) @ w0_obs)  # (1, H)

    w0_comb = jnp.concatenate([w0_obs_eff, w0_ac], axis=0)   # (ob+na, H)

    prepared = {
        "w0": _pad2(w0_comb, in_p, hid_p).astype(compute_dtype),
        "b0": _pad2(b0_eff, 1, hid_p),
        "hidden_w": tuple(
            _pad2(w.astype(f32), hid_p, hid_p).astype(compute_dtype)
            for (w, _b) in params["hidden"]),
        "hidden_b": tuple(
            _pad2(b.astype(f32), 1, hid_p) for (_w, b) in params["hidden"]),
        "w_out": _pad2(params["w_out"].astype(f32), hid_p, out_p)
                 .astype(compute_dtype),
        "b_out": _pad2(params["b_out"].astype(f32), 1, out_p),
        "delta_mean": stats["delta_mean"].astype(f32),
        "delta_std": stats["delta_std"].astype(f32),
    }
    return jax.tree_util.tree_map(jnp.asarray, prepared)


@functools.partial(jax.jit, static_argnames=("is_discrete", "n_acts", "tile_b"))
def dnn_forward(obs, ac, prepared, *, is_discrete, n_acts, tile_b=None):
    """Fused DNN forward.  `prepared` comes from prepare_params().
    Returns (deltas, normalized_deltas) in f32, matching the PyTorch module."""
    f32 = jnp.float32
    batch, ob_dim = obs.shape

    w0 = prepared["w0"]
    in_p, hid_p = w0.shape
    out_p = prepared["w_out"].shape[1]
    compute_dtype = w0.dtype
    out_dtype = compute_dtype            # bf16 writeback when operands are bf16
    n_mid = len(prepared["hidden_w"])

    # ---- Per-call input features: [obs | ac-or-onehot], concat in wrapper ---
    if is_discrete:
        idx = ac.reshape(batch).astype(jnp.int32)   # accepts int or float idx
        ac_feat = jax.nn.one_hot(idx, n_acts, dtype=f32)
    else:
        ac_feat = ac.astype(f32)
    x = jnp.concatenate([obs.astype(f32), ac_feat], axis=1)

    # ---- Batch tiling: prefer >=2 grid steps (megacore / v7x), big tiles ----
    if tile_b is None:
        b_r = _round_up(batch, _SUBLANE)
        if b_r >= 1024:
            tile_b = 512
        else:
            half = _round_up(pl.cdiv(batch, 2), _SUBLANE)
            tile_b = half if half < b_r else b_r
    b_pad = _round_up(batch, tile_b)
    n_grid = b_pad // tile_b

    x_p = _pad2(x, b_pad, in_p).astype(compute_dtype)

    weight_args = [w0, prepared["b0"]]
    for w, b in zip(prepared["hidden_w"], prepared["hidden_b"]):
        weight_args += [w, b]
    weight_args += [prepared["w_out"], prepared["b_out"]]

    # ---- VMEM budget: 2x-buffered tiles + single-buffered resident weights --
    c_bytes = jnp.dtype(compute_dtype).itemsize
    o_bytes = jnp.dtype(out_dtype).itemsize
    tile_in_bytes = tile_b * in_p * c_bytes
    tile_out_bytes = tile_b * out_p * o_bytes
    resident_bytes = sum(int(a.size) * a.dtype.itemsize for a in weight_args)
    live_act_bytes = 3 * tile_b * hid_p * 4      # f32 activations in flight
    vmem_need = (2 * tile_in_bytes + 2 * tile_out_bytes
                 + resident_bytes + live_act_bytes + (2 << 20))
    vmem_limit = int(min(max(vmem_need, 32 << 20), _vmem_cap_bytes()))
    # TODO(synk): if resident_bytes ever exceeds the v7x cap (very large hidden
    # sizes), stream hidden-layer weights (extra grid axis / emit_pipeline)
    # instead of keeping every layer resident.

    in_specs = ([pl.BlockSpec((tile_b, in_p), lambda i: (i, 0))]
                + [_resident_spec(a.shape) for a in weight_args])
    out_specs = pl.BlockSpec((tile_b, out_p), lambda i: (i, 0))

    nd_full = pl.pallas_call(
        _make_kernel(n_mid),
        out_shape=jax.ShapeDtypeStruct((b_pad, out_p), out_dtype),
        grid=(n_grid,),
        in_specs=in_specs,
        out_specs=out_specs,
        compiler_params=pltpu.CompilerParams(
            dimension_semantics=("parallel",),
            vmem_limit_bytes=vmem_limit),
    )(x_p, *weight_args)

    # Slice padding off; un-normalize deltas outside the kernel (keeps kernel
    # writeback to a single lane-dense stream).
    normalized_deltas = nd_full[:batch, :ob_dim].astype(f32)
    deltas = (normalized_deltas * prepared["delta_std"]
              + prepared["delta_mean"])
    return deltas, normalized_deltas


# ----------------------------------------------------------------------------
# Parameter / statistics helpers and a pure-JAX reference for correctness.
# ----------------------------------------------------------------------------
def init_params(key, ob_dim, n_acts, hidden_size, num_layers=1):
    """Shapes match the PyTorch module:
    Linear(ob+na, H), [Linear(H, H)] * (num_layers-1), Linear(H, ob).
    Weights stored as (in_features, out_features); w0 pre-split obs/ac."""
    keys = jax.random.split(key, num_layers + 1)

    def xavier(k, fan_in, fan_out):
        scale = jnp.sqrt(2.0 / (fan_in + fan_out))
        return jax.random.normal(k, (fan_in, fan_out), jnp.float32) * scale

    w0 = xavier(keys[0], ob_dim + n_acts, hidden_size)
    hidden = []
    for i in range(num_layers - 1):
        hidden.append((xavier(keys[1 + i], hidden_size, hidden_size),
                       jnp.zeros((1, hidden_size), jnp.float32)))
    w_out = xavier(keys[num_layers], hidden_size, ob_dim)
    return {
        "w0_obs": w0[:ob_dim],
        "w0_ac": w0[ob_dim:],
        "b0": jnp.zeros((1, hidden_size), jnp.float32),
        "hidden": tuple(hidden),
        "w_out": w_out,
        "b_out": jnp.zeros((1, ob_dim), jnp.float32),
    }


def reference_forward(obs, ac_feat, params, stats):
    """Pure-JAX f32 reference matching the PyTorch forward."""
    nobs = (obs - stats["obs_mean"]) / stats["obs_std"]
    x = jnp.concatenate([nobs, ac_feat], axis=1)
    w0 = jnp.concatenate([params["w0_obs"], params["w0_ac"]], axis=0)
    h = jax.nn.silu(x @ w0 + params["b0"])
    for w, b in params["hidden"]:
        h = jax.nn.silu(h @ w + b)
    nd = h @ params["w_out"] + params["b_out"]
    d = nd * stats["delta_std"] + stats["delta_mean"]
    return d, nd


# TODO(synk): train_net (DataLoader/optimizer loop) is host-side training code
# and is intentionally not translated to a kernel.

if __name__ == "__main__":
    ob_dim, n_acts, hidden_size = 16, 8, 32
    batch = 24
    num_layers = 2   # Linear(ob+na,H) -> Linear(H,H) -> Linear(H,ob)

    key = jax.random.PRNGKey(0)
    k_obs, k_ac, k_par, k_idx, k_s1, k_s2, k_s3, k_s4 = jax.random.split(key, 8)

    obs = jax.random.normal(k_obs, (batch, ob_dim), jnp.float32)
    ac = jax.random.normal(k_ac, (batch, n_acts), jnp.float32)

    params = init_params(k_par, ob_dim, n_acts, hidden_size, num_layers)
    # Non-trivial statistics (exercises the obs-norm fold with std != 1).
    stats = {
        "obs_mean": 0.5 * jax.random.normal(k_s1, (1, ob_dim), jnp.float32),
        "obs_std": jnp.exp(0.3 * jax.random.normal(k_s2, (1, ob_dim))),
        "delta_mean": 0.1 * jax.random.normal(k_s3, (1, ob_dim), jnp.float32),
        "delta_std": jnp.exp(0.3 * jax.random.normal(k_s4, (1, ob_dim))),
    }

    ref_d, ref_nd = reference_forward(obs, ac, params, stats)

    # 1) f32 matmul-operand path: tight check against the pure-JAX reference.
    prep32 = prepare_params(params, stats, compute_dtype=jnp.float32)
    d32, nd32 = dnn_forward(obs, ac, prep32, is_discrete=False, n_acts=n_acts)
    jax.block_until_ready((d32, nd32))
    assert jnp.allclose(d32, ref_d, atol=1e-3, rtol=1e-3)
    assert jnp.allclose(nd32, ref_nd, atol=1e-3, rtol=1e-3)

    # 2) Default bf16 matmul-operand / bf16-writeback path: loose tolerance.
    prep16 = prepare_params(params, stats)   # compute_dtype=bf16
    d16, nd16 = dnn_forward(obs, ac, prep16, is_discrete=False, n_acts=n_acts)
    jax.block_until_ready((d16, nd16))
    assert jnp.allclose(d16, ref_d, atol=5e-2, rtol=5e-2)
    assert jnp.allclose(nd16, ref_nd, atol=5e-2, rtol=5e-2)

    # 3) Discrete-action path: int32 indices, one-hot built in the wrapper and
    #    carried inside the already-128-padded input lanes (no pre-gather).
    ac_idx = jax.random.randint(k_idx, (batch, 1), 0, n_acts)   # int32
    dd, ndd = dnn_forward(obs, ac_idx, prep16, is_discrete=True, n_acts=n_acts)
    jax.block_until_ready((dd, ndd))
    onehot = jax.nn.one_hot(ac_idx.reshape(-1), n_acts, dtype=jnp.float32)
    ref_dd, ref_ndd = reference_forward(obs, onehot, params, stats)
    assert jnp.allclose(dd, ref_dd, atol=5e-2, rtol=5e-2)
    assert jnp.allclose(ndd, ref_ndd, atol=5e-2, rtol=5e-2)

    print("KERNEL_OK")
</pallas_src>

<mosaic_0001>
module attributes {stable_mosaic.version = 11 : i64} {
  func.func @kernel(%arg0: i32, %arg1: memref<16x128xf32, #tpu.memory_space<vmem>>, %arg2: memref<128x128xf32, #tpu.memory_space<vmem>>, %arg3: memref<1x128xf32, #tpu.memory_space<vmem>>, %arg4: memref<128x128xf32, #tpu.memory_space<vmem>>, %arg5: memref<1x128xf32, #tpu.memory_space<vmem>>, %arg6: memref<128x128xf32, #tpu.memory_space<vmem>>, %arg7: memref<1x128xf32, #tpu.memory_space<vmem>>, %arg8: memref<16x128xf32, #tpu.memory_space<vmem>>) attributes {dimension_semantics = [#tpu.dimension_semantics<parallel>], iteration_bounds = array<i64: 2>, scalar_prefetch = 0 : i64, scratch_operands = 0 : i64, tpu.core_type = #tpu.core_type<tc>, window_params = [{transform_indices = @transform_0, window_bounds = array<i64: 16, 128>}, {pipeline_mode = #tpu.pipeline_mode<synchronous>, transform_indices = @transform_1, window_bounds = array<i64: 128, 128>}, {pipeline_mode = #tpu.pipeline_mode<synchronous>, transform_indices = @transform_2, window_bounds = array<i64: 1, 128>}, {pipeline_mode = #tpu.pipeline_mode<synchronous>, transform_indices = @transform_3, window_bounds = array<i64: 128, 128>}, {pipeline_mode = #tpu.pipeline_mode<synchronous>, transform_indices = @transform_4, window_bounds = array<i64: 1, 128>}, {pipeline_mode = #tpu.pipeline_mode<synchronous>, transform_indices = @transform_5, window_bounds = array<i64: 128, 128>}, {pipeline_mode = #tpu.pipeline_mode<synchronous>, transform_indices = @transform_6, window_bounds = array<i64: 1, 128>}, {transform_indices = @transform_7, window_bounds = array<i64: 16, 128>}]} {
    %c0 = arith.constant 0 : index
    %c0_0 = arith.constant 0 : index
    %0 = vector.load %arg1[%c0, %c0_0] : memref<16x128xf32, #tpu.memory_space<vmem>>, vector<16x128xf32>
    %c0_1 = arith.constant 0 : index
    %c0_2 = arith.constant 0 : index
    %1 = vector.load %arg2[%c0_1, %c0_2] : memref<128x128xf32, #tpu.memory_space<vmem>>, vector<128x128xf32>
    %cst = arith.constant dense<0.000000e+00> : vector<16x128xf32>
    %2 = tpu.matmul %0, %1, %cst {dimension_numbers = #tpu.dot_dimension_numbers<[1], [0], [0], [1], [0, 0, 1, 1], [], []>} : vector<16x128xf32>, vector<128x128xf32>, vector<16x128xf32> -> vector<16x128xf32>
    %c0_3 = arith.constant 0 : index
    %c0_4 = arith.constant 0 : index
    %3 = vector.load %arg3[%c0_3, %c0_4] : memref<1x128xf32, #tpu.memory_space<vmem>>, vector<1x128xf32>
    %4 = vector.broadcast %3 : vector<1x128xf32> to vector<16x128xf32>
    %5 = arith.addf %2, %4 : vector<16x128xf32>
    %6 = arith.negf %5 : vector<16x128xf32>
    %7 = math.exp %6 : vector<16x128xf32>
    %cst_5 = arith.constant 1.000000e+00 : f32
    %8 = vector.broadcast %cst_5 : f32 to vector<16x128xf32>
    %9 = arith.addf %8, %7 : vector<16x128xf32>
    %10 = arith.divf %8, %9 : vector<16x128xf32>
    %11 = arith.mulf %5, %10 : vector<16x128xf32>
    %c0_6 = arith.constant 0 : index
    %c0_7 = arith.constant 0 : index
    %12 = vector.load %arg4[%c0_6, %c0_7] : memref<128x128xf32, #tpu.memory_space<vmem>>, vector<128x128xf32>
    %cst_8 = arith.constant dense<0.000000e+00> : vector<16x128xf32>
    %13 = tpu.matmul %11, %12, %cst_8 {dimension_numbers = #tpu.dot_dimension_numbers<[1], [0], [0], [1], [0, 0, 1, 1], [], []>} : vector<16x128xf32>, vector<128x128xf32>, vector<16x128xf32> -> vector<16x128xf32>
    %c0_9 = arith.constant 0 : index
    %c0_10 = arith.constant 0 : index
    %14 = vector.load %arg5[%c0_9, %c0_10] : memref<1x128xf32, #tpu.memory_space<vmem>>, vector<1x128xf32>
    %15 = vector.broadcast %14 : vector<1x128xf32> to vector<16x128xf32>
    %16 = arith.addf %13, %15 : vector<16x128xf32>
    %17 = arith.negf %16 : vector<16x128xf32>
    %18 = math.exp %17 : vector<16x128xf32>
    %cst_11 = arith.constant 1.000000e+00 : f32
    %19 = vector.broadcast %cst_11 : f32 to vector<16x128xf32>
    %20 = arith.addf %19, %18 : vector<16x128xf32>
    %21 = arith.divf %19, %20 : vector<16x128xf32>
    %22 = arith.mulf %16, %21 : vector<16x128xf32>
    %c0_12 = arith.constant 0 : index
    %c0_13 = arith.constant 0 : index
    %23 = vector.load %arg6[%c0_12, %c0_13] : memref<128x128xf32, #tpu.memory_space<vmem>>, vector<128x128xf32>
    %cst_14 = arith.constant dense<0.000000e+00> : vector<16x128xf32>
    %24 = tpu.matmul %22, %23, %cst_14 {dimension_numbers = #tpu.dot_dimension_numbers<[1], [0], [0], [1], [0, 0, 1, 1], [], []>} : vector<16x128xf32>, vector<128x128xf32>, vector<16x128xf32> -> vector<16x128xf32>
    %c0_15 = arith.constant 0 : index
    %c0_16 = arith.constant 0 : index
    %25 = vector.load %arg7[%c0_15, %c0_16] : memref<1x128xf32, #tpu.memory_space<vmem>>, vector<1x128xf32>
    %26 = vector.broadcast %25 : vector<1x128xf32> to vector<16x128xf32>
    %27 = arith.addf %24, %26 : vector<16x128xf32>
    %c0_17 = arith.constant 0 : index
    %c0_18 = arith.constant 0 : index
    %28 = vector.load %arg8[%c0_17, %c0_18] : memref<16x128xf32, #tpu.memory_space<vmem>>, vector<16x128xf32>
    tpu.vector_store %arg8[%c0_17, %c0_18], %27 {strides = array<i32>} : memref<16x128xf32, #tpu.memory_space<vmem>>, vector<16x128xf32>,
    return
  }
  func.func @transform_0(%arg0: i32) -> (i32, i32) {
    %c0_i32 = arith.constant 0 : i32
    %c0_i32_0 = arith.constant 0 : i32
    return %arg0, %c0_i32 : i32, i32
  }
  func.func @transform_1(%arg0: i32) -> (i32, i32) {
    %c0_i32 = arith.constant 0 : i32
    %c0_i32_0 = arith.constant 0 : i32
    %c0_i32_1 = arith.constant 0 : i32
    return %c0_i32, %c0_i32_0 : i32, i32
  }
  func.func @transform_2(%arg0: i32) -> (i32, i32) {
    %c0_i32 = arith.constant 0 : i32
    %c0_i32_0 = arith.constant 0 : i32
    %c0_i32_1 = arith.constant 0 : i32
    return %c0_i32, %c0_i32_0 : i32, i32
  }
  func.func @transform_3(%arg0: i32) -> (i32, i32) {
    %c0_i32 = arith.constant 0 : i32
    %c0_i32_0 = arith.constant 0 : i32
    %c0_i32_1 = arith.constant 0 : i32
    return %c0_i32, %c0_i32_0 : i32, i32
  }
  func.func @transform_4(%arg0: i32) -> (i32, i32) {
    %c0_i32 = arith.constant 0 : i32
    %c0_i32_0 = arith.constant 0 : i32
    %c0_i32_1 = arith.constant 0 : i32
    return %c0_i32, %c0_i32_0 : i32, i32
  }
  func.func @transform_5(%arg0: i32) -> (i32, i32) {
    %c0_i32 = arith.constant 0 : i32
    %c0_i32_0 = arith.constant 0 : i32
    %c0_i32_1 = arith.constant 0 : i32
    return %c0_i32, %c0_i32_0 : i32, i32
  }
  func.func @transform_6(%arg0: i32) -> (i32, i32) {
    %c0_i32 = arith.constant 0 : i32
    %c0_i32_0 = arith.constant 0 : i32
    %c0_i32_1 = arith.constant 0 : i32
    return %c0_i32, %c0_i32_0 : i32, i32
  }
  func.func @transform_7(%arg0: i32) -> (i32, i32) {
    %c0_i32 = arith.constant 0 : i32
    %c0_i32_0 = arith.constant 0 : i32
    return %arg0, %c0_i32 : i32, i32
  }
}

</mosaic_0001>

<bundles_post_ra>
// kernel: dnn_forward.1
= control target key start
LH: loop header
LB: loop body
LE: loop exit
PB: predicated region body
PF: predicated region fallthrough
CT: control target
= control target key end

     0   :  { %12 = vsyncpa [#allocation3], 0  ;;  %s925_s0 = inlined_call_operand.vmem [shape: f32[32,128], index: 0, kind: input, shape index: {}]   ;;  %s926_s1 = inlined_call_operand.vmem [shape: f32[128,128], index: 1, kind: input, shape index: {}]   ;;  %s927_s2 = inlined_call_operand.vmem [shape: f32[1,128], index: 2, kind: input, shape index: {}]   ;;  %s928_s3 = inlined_call_operand.hbm [shape: f32[128,128], index: 3, kind: input, shape index: {}]   ;;  %s929_s4 = inlined_call_operand.vmem [shape: f32[1,128], index: 4, kind: input, shape index: {}]   ;;  %s930_s5 = inlined_call_operand.hbm [shape: f32[128,128], index: 5, kind: input, shape index: {}]   ;;  %s931_s6 = inlined_call_operand.vmem [shape: f32[1,128], index: 6, kind: input, shape index: {}]   ;;  %s932_s7 = inlined_call_operand.vmem [shape: f32[32,128], index: 7, kind: output, shape index: {}]  }
   0x1   :  { %13 = vsyncpa [#allocation5], 0  ;;  %s812_s24 = smov 0  }
   0x2 LB: > { %s219_s27 = sshll.u32 %s928_s3, 4  ;;  %s607_s28 = sadd.s32 4294967295, %s766_s24   ;;  %s766_s24 = sphi %s812_s24, %s19_s24   ;;  %s220_s27 = int_to_ptr.hbm [resolvable:$true] %s219_s27 }
   0x3   : > { %p609_p0 = scmp.ge.s32.totalorder %s766_s24, 1  ;;  %p202_p1 = scmp.lt.s32.totalorder %s766_s24, 3 }
   0x4   : > { %p825_p2 = scmp.eq.s32.totalorder %s607_s28, 0  ;;  %s768_s8 = smov [#allocation2]  }
   0x5   : > { %p829_p3 = pnand %p609_p0, %p202_p1  ;;  %s221_s9 = sshll.u32 %s768_s8, 4  ;;  %s222_s9 = int_to_ptr.vmem [resolvable:$true] %s221_s9 }
   0x6   : > { %s236_s12 = sshll.u32 %s930_s5, 4  ;;  %s769_s13 = smov [#allocation4]   ;;  %s237_s12 = int_to_ptr.hbm [resolvable:$true] %s236_s12 }
   0x7   : > { %p650_p4 = pneg %p829_p3  ;;  %s238_s14 = sshll.u32 %s769_s13, 4  ;;  %s239_s14 = int_to_ptr.vmem [resolvable:$true] %s238_s14 }
   0x8   : > { %s770_s15 = smov 128   ;;  %s771_s16 = smov 8  }
   0x9   : > { %p651_p5 = pnand %p825_p2, %p650_p4  ;;  %266 = sbr.rel (%p829_p3) target bundleno = 508 (0x1fc), region = 48 }
   0xb   : > { %653 = dma.hbm_to_vmem [thread:$0]  (!%p651_p5), %s220_s27, 2048, %s222_s9, [#allocation3], %s770_s15, %s770_s15, %s771_s16  }
   0xc   : > { %656 = dma.hbm_to_vmem [thread:$0]  (!%p651_p5), %s237_s12, 2048, %s239_s14, [#allocation5], %s770_s15, %s770_s15, %s771_s16  }
   0xe   : > { %757 = dma.done.wait (%p825_p2), [#allocation3], 2048  }
   0xf   : > { %759 = vsyncadd (%p825_p2), [#allocation3], 4294965248 }
  0x10   : > { %761 = dma.done.wait (%p825_p2), [#allocation5], 2048  }
  0x11   : > { %763 = vsyncadd (%p825_p2), [#allocation5], 4294965248  ;;  %v333_v0 = vld [vmem:[%s926_s1 + $0x78] sm:$0xff]  ;;  %v332_v1 = vld [vmem:[%s926_s1 + $0x70] sm:$0xff]  ;;  %s616_s12 = sshll.u32 %s607_s28, 1 }
  0x12   : > { %338 = vmatpush.msra.mxu0 %v333_v0  ;;  %626 = vmatpush.msra.mxu3 %v333_v0  ;;  %v331_v2 = vld [vmem:[%s926_s1 + $0x68] sm:$0xff]  ;;  %v330_v3 = vld [vmem:[%s926_s1 + $0x60] sm:$0xff]  ;;  %v329_v4 = vld [vmem:[%s926_s1 + $0x58] sm:$0xff]  ;;  %p305_p6 = scmp.lt.s32.totalorder %s616_s12, 3 }
  0x13   : > { %v328_v5 = vld [vmem:[%s926_s1 + $0x50] sm:$0xff]  ;;  %v327_v6 = vld [vmem:[%s926_s1 + $0x48] sm:$0xff]  ;;  %v326_v7 = vld [vmem:[%s926_s1 + $0x40] sm:$0xff] }
  0x14   : > { %339 = vmatpush.msra.mxu0 %v332_v1  ;;  %627 = vmatpush.msra.mxu3 %v332_v1  ;;  %v325_v8 = vld [vmem:[%s926_s1 + $0x38] sm:$0xff]  ;;  %v324_v9 = vld [vmem:[%s926_s1 + $0x30] sm:$0xff]  ;;  %v323_v10 = vld [vmem:[%s926_s1 + $0x28] sm:$0xff]  ;;  %s936_s12 = smov (!%p305_p6, %s616_s12), 3 }
  0x15   : > { %v322_v11 = vld [vmem:[%s926_s1 + $0x20] sm:$0xff]  ;;  %v321_v12 = vld [vmem:[%s926_s1 + $0x18] sm:$0xff]  ;;  %s617_s22 = sshll.u32 %s936_s12, 3  ;;  %v320_v13 = vld [vmem:[%s926_s1 + $0x10] sm:$0xff] }
  0x16   : > { %340 = vmatpush.msra.mxu0 %v331_v2  ;;  %628 = vmatpush.msra.mxu3 %v331_v2  ;;  %v319_v14 = vld [vmem:[%s926_s1 + $0x8] sm:$0xff]  ;;  %s308_s8 = scalar_lea.vmem %s925_s0, %s617_s22  ;;  %v318_v15 = vld [vmem:[%s926_s1] sm:$0xff]  ;;  %v416_v18 = vld [vmem:[#allocation2 + $0x78] sm:$0xff]  ;;  %s314_s19 = scalar_lea.vmem %s932_s7, %s617_s22 }
  0x17   : > { %v316_v16 = vld [vmem:[%s308_s8] sm:$0xff]  ;;  %v317_v17 = vld [vmem:[%s308_s8 + $0x8] sm:$0xff]  ;;  %421 = vmatpush.msra.mxu1 %v416_v18  ;;  %v415_v19 = vld [vmem:[#allocation2 + $0x70] sm:$0xff] }
  0x18   : > { %341 = vmatpush.msra.mxu0 %v330_v3  ;;  %629 = vmatpush.msra.mxu3 %v330_v3  ;;  %v414_v20 = vld [vmem:[#allocation2 + $0x68] sm:$0xff]  ;;  %v413_v21 = vld [vmem:[#allocation2 + $0x60] sm:$0xff]  ;;  %v412_v22 = vld [vmem:[#allocation2 + $0x58] sm:$0xff] }
  0x19   : > { %422 = vmatpush.msra.mxu1 %v415_v19  ;;  %v411_v23 = vld [vmem:[#allocation2 + $0x50] sm:$0xff]  ;;  %v410_v24 = vld [vmem:[#allocation2 + $0x48] sm:$0xff]  ;;  %v409_v25 = vld [vmem:[#allocation2 + $0x40] sm:$0xff] }
  0x1a   : > { %342 = vmatpush.msra.mxu0 %v329_v4  ;;  %630 = vmatpush.msra.mxu3 %v329_v4  ;;  %v408_v26 = vld [vmem:[#allocation2 + $0x38] sm:$0xff]  ;;  %v407_v27 = vld [vmem:[#allocation2 + $0x30] sm:$0xff]  ;;  %v406_v28 = vld [vmem:[#allocation2 + $0x28] sm:$0xff] }
  0x1b   : > { %423 = vmatpush.msra.mxu1 %v414_v20  ;;  %v405_v29 = vld [vmem:[#allocation2 + $0x20] sm:$0xff]  ;;  %v404_v30 = vld [vmem:[#allocation2 + $0x18] sm:$0xff]  ;;  %v403_v31 = vld [vmem:[#allocation2 + $0x10] sm:$0xff] }
  0x1c   : > { %343 = vmatpush.msra.mxu0 %v328_v5  ;;  %631 = vmatpush.msra.mxu3 %v328_v5  ;;  %v402_v32 = vld [vmem:[#allocation2 + $0x8] sm:$0xff]  ;;  %v673_v33 = vld [vmem:[%s927_s2] ss:$0 sm:$0xff]  ;;  %v499_v3 = vld [vmem:[#allocation4 + $0x78] sm:$0xff] }
  0x1d   : > { %424 = vmatpush.msra.mxu1 %v413_v21  ;;  %v401_v34 = vld [vmem:[#allocation2] sm:$0xff]  ;;  %504 = vmatpush.msra.mxu2 %v499_v3  ;;  %v498_v4 = vld [vmem:[#allocation4 + $0x70] sm:$0xff]  ;;  %v497_v5 = vld [vmem:[#allocation4 + $0x68] sm:$0xff] }
  0x1e   : > { %344 = vmatpush.msra.mxu0 %v327_v6  ;;  %632 = vmatpush.msra.mxu3 %v327_v6  ;;  %v496_v6 = vld [vmem:[#allocation4 + $0x60] sm:$0xff] }
  0x1f   : > { %425 = vmatpush.msra.mxu1 %v412_v22  ;;  %505 = vmatpush.msra.mxu2 %v498_v4  ;;  %v674_v18 = vld [vmem:[%s929_s4] ss:$0 sm:$0xff] }
  0x20   : > { %345 = vmatpush.msra.mxu0 %v326_v7  ;;  %633 = vmatpush.msra.mxu3 %v326_v7  ;;  %v495_v7 = vld [vmem:[#allocation4 + $0x58] sm:$0xff]  ;;  %v484_v19 = vld [vmem:[#allocation4] sm:$0xff] }
  0x21   : > { %426 = vmatpush.msra.mxu1 %v411_v23  ;;  %506 = vmatpush.msra.mxu2 %v497_v5 }
  0x22   : > { %346 = vmatpush.msra.mxu0 %v325_v8  ;;  %634 = vmatpush.msra.mxu3 %v325_v8  ;;  %v494_v8 = vld [vmem:[#allocation4 + $0x50] sm:$0xff] }
  0x23   : > { %427 = vmatpush.msra.mxu1 %v410_v24  ;;  %507 = vmatpush.msra.mxu2 %v496_v6 }
  0x24   : > { %347 = vmatpush.msra.mxu0 %v324_v9  ;;  %635 = vmatpush.msra.mxu3 %v324_v9  ;;  %v493_v9 = vld [vmem:[#allocation4 + $0x48] sm:$0xff] }
  0x25   : > { %428 = vmatpush.msra.mxu1 %v409_v25  ;;  %508 = vmatpush.msra.mxu2 %v495_v7 }
  0x26   : > { %348 = vmatpush.msra.mxu0 %v323_v10  ;;  %636 = vmatpush.msra.mxu3 %v323_v10  ;;  %v492_v10 = vld [vmem:[#allocation4 + $0x40] sm:$0xff] }
  0x27   : > { %429 = vmatpush.msra.mxu1 %v408_v26  ;;  %509 = vmatpush.msra.mxu2 %v494_v8 }
  0x28   : > { %349 = vmatpush.msra.mxu0 %v322_v11  ;;  %637 = vmatpush.msra.mxu3 %v322_v11  ;;  %v491_v11 = vld [vmem:[#allocation4 + $0x38] sm:$0xff] }
  0x29   : > { %430 = vmatpush.msra.mxu1 %v407_v27  ;;  %510 = vmatpush.msra.mxu2 %v493_v9 }
  0x2a   : > { %350 = vmatpush.msra.mxu0 %v321_v12  ;;  %638 = vmatpush.msra.mxu3 %v321_v12  ;;  %v490_v12 = vld [vmem:[#allocation4 + $0x30] sm:$0xff] }
  0x2b   : > { %431 = vmatpush.msra.mxu1 %v406_v28  ;;  %511 = vmatpush.msra.mxu2 %v492_v10 }
  0x2c   : > { %351 = vmatpush.msra.mxu0 %v320_v13  ;;  %639 = vmatpush.msra.mxu3 %v320_v13  ;;  %v489_v13 = vld [vmem:[#allocation4 + $0x28] sm:$0xff] }
  0x2d   : > { %432 = vmatpush.msra.mxu1 %v405_v29  ;;  %512 = vmatpush.msra.mxu2 %v491_v11 }
  0x2e   : > { %352 = vmatpush.msra.mxu0 %v319_v14  ;;  %640 = vmatpush.msra.mxu3 %v319_v14  ;;  %v488_v14 = vld [vmem:[#allocation4 + $0x20] sm:$0xff] }
  0x2f   : > { %433 = vmatpush.msra.mxu1 %v404_v30  ;;  %513 = vmatpush.msra.mxu2 %v490_v12 }
  0x30   : > { %353 = vmatpush.msra.mxu0 %v318_v15  ;;  %641 = vmatpush.msra.mxu3 %v318_v15  ;;  %v487_v15 = vld [vmem:[#allocation4 + $0x18] sm:$0xff] }
  0x31   : > { %354 = vmatmul.f32.vlgmr.msra.gmra.mxu0 %v316_v16  ;;  %357 = vmatmul.f32.vlgmr.msra.gmra.mxu3 %v317_v17  ;;  %v486_v16 = vld [vmem:[#allocation4 + $0x10] sm:$0xff]  ;;  %v485_v17 = vld [vmem:[#allocation4 + $0x8] sm:$0xff] }
  0x32   : > { %434 = vmatpush.msra.mxu1 %v403_v31  ;;  %514 = vmatpush.msra.mxu2 %v489_v13 }
  0x34   : > { %435 = vmatpush.msra.mxu1 %v402_v32  ;;  %515 = vmatpush.msra.mxu2 %v488_v14 }
  0x36   : > { %436 = vmatpush.msra.mxu1 %v401_v34  ;;  %516 = vmatpush.msra.mxu2 %v487_v15 }
  0x38   : > { %517 = vmatpush.msra.mxu2 %v486_v16 }
  0x3a   : > { %518 = vmatpush.msra.mxu2 %v485_v17 }
  0x3c   : > { %519 = vmatpush.msra.mxu2 %v484_v19 }
  0xae   : > { %v355_v35 = vpop.f32.mrf.mxu0 }
  0xaf   : > { %v356_v36 = vadd.f32 %v673_v33, %v355_v35 }
  0xb1   : > { %v620_v37 = vmul.f32 -1.442695, %v356_v36 }
  0xb3   : > { %676 = vpow2.f32 %v620_v37 }
  0xb4   : > { %v358_v38 = vpop.f32.mrf.mxu3 }
  0xb5   : > { %v359_v39 = vadd.f32 %v673_v33, %v358_v38 }
  0xb7   : > { %v621_v40 = vmul.f32 -1.442695, %v359_v39 }
  0xb9   : > { %v677_v41 = vpop.eup %676  ;;  %678 = vpow2.f32 %v621_v40 }
  0xba   : > { %v367_v42 = vadd.f32 1.0, %v677_v41 }
  0xbc   : > { %680 = vrcp.f32 %v367_v42  ;;  %v380_v48 = vand.u32 2147483648, %v367_v42  ;;  %v378_v50 = vand.u32 2147483647, %v367_v42  ;;  %vm374_vm1 = vweird.f32 %v367_v42 }
  0xbe   : > { %v381_v54 = vor.u32 1.1754944e-38, %v380_v48  ;;  %vm379_vm3 = vcmp.eq.f32.partialorder %v378_v50, 8.507059e+37 }
  0xbf   : > { %v679_v43 = vpop.eup %678 }
  0xc0   : > { %v368_v44 = vadd.f32 1.0, %v679_v43 }
  0xc2   : > { %v681_v45 = vpop.eup %680  ;;  %682 = vrcp.f32 %v368_v44  ;;  %v395_v58 = vand.u32 2147483648, %v368_v44  ;;  %v393_v61 = vand.u32 2147483647, %v368_v44  ;;  %vm389_vm5 = vweird.f32 %v368_v44 }
  0xc3   : > { %v370_v46 = vmul.f32 %v681_v45, %v367_v42  ;;  %vm375_vm0 = vweird.f32 %v681_v45 }
  0xc4   : > { %vm376_vm2 = vmor %vm374_vm1, %vm375_vm0  ;;  %v396_v63 = vor.u32 1.1754944e-38, %v395_v58  ;;  %vm394_vm7 = vcmp.eq.f32.partialorder %v393_v61, 8.507059e+37 }
  0xc5   : > { %v371_v47 = vsub.f32 1.0, %v370_v46 }
  0xc7   : > { %v372_v49 = vmul.f32 %v681_v45, %v371_v47 }
  0xc8   : > { %v683_v51 = vpop.eup %682 }
  0xc9   : > { %v373_v52 = vadd.f32 %v681_v45, %v372_v49  ;;  %v385_v53 = vmul.f32 %v683_v51, %v368_v44  ;;  %vm390_vm4 = vweird.f32 %v683_v51 }
  0xca   : > { %vm391_vm6 = vmor %vm389_vm5, %vm390_vm4 }
  0xcb   : > { %v377_v55 = vsel %vm376_vm2, %v681_v45, %v373_v52  ;;  %v386_v56 = vsub.f32 1.0, %v385_v53  ;;  %v675_v52 = vld [vmem:[%s931_s6] ss:$0 sm:$0xff] }
  0xcc   : > { %v382_v57 = vsel %vm379_vm3, %v381_v54, %v377_v55 }
  0xcd   : > { %v399_v59 = vmul.f32 %v382_v57, %v356_v36  ;;  %v387_v60 = vmul.f32 %v683_v51, %v386_v56 }
  0xcf   : > { %437 = vmatmul.f32.vlgmr.msra.gmra.mxu1 %v399_v59  ;;  %v388_v62 = vadd.f32 %v683_v51, %v387_v60 }
  0xd1   : > { %v392_v0 = vsel %vm391_vm6, %v683_v51, %v388_v62 }
  0xd2   : > { %v397_v1 = vsel %vm394_vm7, %v396_v63, %v392_v0 }
  0xd3   : > { %v400_v2 = vmul.f32 %v397_v1, %v359_v39 }
  0xd7   : > { %440 = vmatmul.f32.gmra.mxu1 %v400_v2 }
 0x14c   : > { %v438_v20 = vpop.f32.mrf.mxu1 }
 0x14d   : > { %v439_v21 = vadd.f32 %v674_v18, %v438_v20 }
 0x14f   : > { %v622_v22 = vmul.f32 -1.442695, %v439_v21 }
 0x151   : > { %684 = vpow2.f32 %v622_v22 }
 0x154   : > { %v441_v23 = vpop.f32.mrf.mxu1 }
 0x155   : > { %v442_v24 = vadd.f32 %v674_v18, %v441_v23 }
 0x157   : > { %v685_v25 = vpop.eup %684  ;;  %v623_v26 = vmul.f32 -1.442695, %v442_v24 }
 0x158   : > { %v450_v27 = vadd.f32 1.0, %v685_v25 }
 0x159   : > { %686 = vpow2.f32 %v623_v26 }
 0x15a   : > { %688 = vrcp.f32 %v450_v27  ;;  %v463_v33 = vand.u32 2147483648, %v450_v27  ;;  %v461_v35 = vand.u32 2147483647, %v450_v27  ;;  %vm457_vm9 = vweird.f32 %v450_v27 }
 0x15c   : > { %v464_v38 = vor.u32 1.1754944e-38, %v463_v33  ;;  %vm462_vm11 = vcmp.eq.f32.partialorder %v461_v35, 8.507059e+37 }
 0x15f   : > { %v687_v28 = vpop.eup %686 }
 0x160   : > { %v689_v29 = vpop.eup %688  ;;  %v451_v30 = vadd.f32 1.0, %v687_v28 }
 0x161   : > { %v453_v31 = vmul.f32 %v689_v29, %v450_v27  ;;  %vm458_vm8 = vweird.f32 %v689_v29 }
 0x162   : > { %690 = vrcp.f32 %v451_v30  ;;  %vm459_vm10 = vmor %vm457_vm9, %vm458_vm8  ;;  %v478_v44 = vand.u32 2147483648, %v451_v30  ;;  %v476_v46 = vand.u32 2147483647, %v451_v30  ;;  %vm472_vm13 = vweird.f32 %v451_v30 }
 0x163   : > { %v454_v32 = vsub.f32 1.0, %v453_v31 }
 0x164   : > { %v479_v48 = vor.u32 1.1754944e-38, %v478_v44  ;;  %vm477_vm15 = vcmp.eq.f32.partialorder %v476_v46, 8.507059e+37 }
 0x165   : > { %v455_v34 = vmul.f32 %v689_v29, %v454_v32 }
 0x167   : > { %v456_v36 = vadd.f32 %v689_v29, %v455_v34 }
 0x168   : > { %v691_v37 = vpop.eup %690 }
 0x169   : > { %v460_v39 = vsel %vm459_vm10, %v689_v29, %v456_v36  ;;  %v468_v40 = vmul.f32 %v691_v37, %v451_v30  ;;  %vm473_vm12 = vweird.f32 %v691_v37 }
 0x16a   : > { %v465_v41 = vsel %vm462_vm11, %v464_v38, %v460_v39  ;;  %vm474_vm14 = vmor %vm472_vm13, %vm473_vm12 }
 0x16b   : > { %v482_v42 = vmul.f32 %v465_v41, %v439_v21  ;;  %v469_v43 = vsub.f32 1.0, %v468_v40 }
 0x16d   : > { %520 = vmatmul.f32.vlgmr.msra.gmra.mxu2 %v482_v42  ;;  %v470_v45 = vmul.f32 %v691_v37, %v469_v43 }
 0x16f   : > { %v471_v47 = vadd.f32 %v691_v37, %v470_v45 }
 0x171   : > { %v475_v49 = vsel %vm474_vm14, %v691_v37, %v471_v47 }
 0x172   : > { %v480_v50 = vsel %vm477_vm15, %v479_v48, %v475_v49 }
 0x173   : > { %v483_v51 = vmul.f32 %v480_v50, %v442_v24 }
 0x175   : > { %523 = vmatmul.f32.gmra.mxu2 %v483_v51 }
 0x1f0   : > { %v521_v53 = vpop.f32.mrf.mxu2 }
 0x1f1   : > { %v522_v54 = vadd.f32 %v675_v52, %v521_v53 }
 0x1f3   : > { %527 = vst [vmem:[%s314_s19] sm:$0xff] %v522_v54 }
 0x1f8   : > { %v524_v55 = vpop.f32.mrf.mxu2 }
 0x1f9   : > { %v525_v56 = vadd.f32 %v675_v52, %v524_v55 }
 0x1fb   : > { %528 = vst [vmem:[%s314_s19 + $0x8] sm:$0xff] %v525_v56 }
 0x1fc PF: > { %s19_s24 = sadd.s32 1, %s766_s24  }
 0x1fd   : > { %p16_p7 = scmp.ge.s32.totalorder %s19_s24, 4  }
 0x1ff   :  { %18 = sbr.rel (!%p16_p7) target bundleno = 2 (0x2), region = 87 }
 0x204   :  { %551 = vsyncpa [#allocation3], 1 }
 0x205   :  { %553 = vsyncpa [#allocation3 + $0x1], 1 }
 0x206   :  { %554 = vsyncpa [#allocation5], 1 }

</bundles_post_ra>
